<compile_context>
chip_gen: v5e
topology: v5e:2x2
jax: 0.10.0
libtpu: 0.0.40
codegen_flags: <defaults>
</compile_context>

<pallas_src>
import jax
import jax.numpy as jnp
from jax.experimental import pallas as pl
from jax.experimental.pallas import tpu as pltpu


CHANNELS = 32   # conv output channels == LSTM "batch" dimension
PATCH = 16      # 4*4 conv kernel elements
FEAT = 49       # 7*7 spatial positions == LSTM feature size


# ------------------------------ fused kernel --------------------------------

def _make_fused_kernel(num_layers, hidden_size, seq_len):
    """Single fused kernel: conv-as-matmul + all LSTM layers + final FC."""
    H = hidden_size
    N = CHANNELS
    T = seq_len          # sequence length == image batch B (static, small)

    def kernel(*refs):
        # -- unpack: inputs, output, scratch ---------------------------------
        pT_ref, convw_ref = refs[0], refs[1]
        layer_refs = [(refs[2 + 3 * l], refs[3 + 3 * l], refs[4 + 3 * l])
                      for l in range(num_layers)]
        fcw_ref = refs[2 + 3 * num_layers]
        fcb_ref = refs[3 + 3 * num_layers]
        out_ref = refs[4 + 3 * num_layers]
        xp_scr, hseq_scr = refs[5 + 3 * num_layers:]

        def lstm_gates(gates, c_prev):
            # PyTorch gate order [i, f, g, o]; all gate math in f32.
            i = jax.nn.sigmoid(gates[:, 0 * H:1 * H])
            f = jax.nn.sigmoid(gates[:, 1 * H:2 * H])
            g = jnp.tanh(gates[:, 2 * H:3 * H])
            o = jax.nn.sigmoid(gates[:, 3 * H:4 * H])
            c = f * c_prev + i * g
            h = o * jnp.tanh(c)
            return h, c

        # -- layer-0 input projection (conv folded in), hoisted out of recurrence
        wih0_ref, _, b0_ref = layer_refs[0]
        # A[t*16+k, :] = patches_T[t] @ W_ih0^T  -- one matmul for all timesteps.
        a = jnp.dot(pT_ref[...], wih0_ref[...],
                    preferred_element_type=jnp.float32)          # [T*16, 4H] f32
        convw = convw_ref[...]                                    # [32, 16] bf16
        b0 = b0_ref[...]                                          # [32, 4H] f32

        for t in range(T):                                        # static unroll
            a_t = a[t * PATCH:(t + 1) * PATCH, :].astype(jnp.bfloat16)   # [16, 4H]
            xp_scr[t * N:(t + 1) * N, :] = (
                jnp.dot(convw, a_t, preferred_element_type=jnp.float32) + b0)

        # -- LSTM layers -------------------------------------------------------
        last_rows = []                                            # channel-31 h per step
        for l in range(num_layers):
            wih_ref, whh_ref, b_ref = layer_refs[l]
            if l > 0:
                # whole-sequence input projection as ONE matmul [T*N, H] @ [H, 4H]
                xp_scr[...] = (
                    jnp.dot(hseq_scr[...].astype(jnp.bfloat16), wih_ref[...],
                            preferred_element_type=jnp.float32) + b_ref[...])
            whh = whh_ref[...]                                    # [H, 4H] bf16
            is_last = (l == num_layers - 1)

            h = jnp.zeros((N, H), jnp.float32)
            c = jnp.zeros((N, H), jnp.float32)
            for t in range(T):                                    # serial recurrence
                gates = xp_scr[t * N:(t + 1) * N, :] + jnp.dot(
                    h.astype(jnp.bfloat16), whh,
                    preferred_element_type=jnp.float32)
                h, c = lstm_gates(gates, c)
                if is_last:
                    # only channel N-1 (== torch out[-1, :, :]) is needed downstream
                    last_rows.append(h[N - 1:N, :])
                else:
                    hseq_scr[t * N:(t + 1) * N, :] = h

        # -- final FC on the [T, H] slab of channel-(N-1) hidden states ---------
        last = jnp.concatenate(last_rows, axis=0)                 # [T, H] f32
        out_ref[...] = (
            jnp.dot(last.astype(jnp.bfloat16), fcw_ref[...],
                    preferred_element_type=jnp.float32) + fcb_ref[...]
        ).astype(out_ref.dtype)

    return kernel


# ------------------------------ wrapper --------------------------------------

def prepare_params(params):
    """One-time weight prep: transposes, bias fusion, bf16 casts (hoisted out of forward)."""
    num_layers = params["num_layers"]
    prep = {}
    prep["conv_w"] = params["conv_w"].reshape(CHANNELS, PATCH).astype(jnp.bfloat16)
    for l in range(num_layers):
        wih_t = params[f"w_ih_{l}"].T                                   # [D, 4H]
        prep[f"w_ih_{l}"] = wih_t.astype(jnp.bfloat16)
        prep[f"w_hh_{l}"] = params[f"w_hh_{l}"].T.astype(jnp.bfloat16)  # [H, 4H]
        b = (params[f"b_ih_{l}"] + params[f"b_hh_{l}"]).astype(jnp.float32)
        if l == 0:
            # Fold the conv bias into the layer-0 projection bias:
            #   b0[n, :] = conv_b[n] * sum_d W_ih0^T[d, :] + b_ih0 + b_hh0
            prep["b_0"] = (params["conv_b"][:, None] * jnp.sum(wih_t, axis=0)[None, :]
                           + b[None, :]).astype(jnp.float32)            # [32, 4H]
        else:
            prep[f"b_{l}"] = b[None, :]                                 # [1, 4H]
    prep["fc_w"] = params["fc_w"].T.astype(jnp.bfloat16)                # [H, out]
    prep["fc_b"] = params["fc_b"][None, :].astype(jnp.float32)          # [1, out]
    return prep


def build_forward(num_layers, hidden_size, output_size):
    """Returns a jitted forward(x, prep) that runs ONE fused pallas_call."""

    def forward(x, prep):
        B = x.shape[0]
        H = hidden_size
        # Extract non-overlapping 4x4 patches directly in the "transposed" layout
        #   pT[b*16 + (r*4+c), i*7+j] = x[b, 0, i*4+r, j*4+c]
        # so the kernel never needs an in-kernel transpose to reach [T=B, N=32, D=49].
        pT = (x.reshape(B, 7, 4, 7, 4)
                .transpose(0, 2, 4, 1, 3)
                .reshape(B * PATCH, FEAT)
                .astype(jnp.bfloat16))

        args = [pT, prep["conv_w"]]
        for l in range(num_layers):
            args += [prep[f"w_ih_{l}"], prep[f"w_hh_{l}"], prep[f"b_{l}"]]
        args += [prep["fc_w"], prep["fc_b"]]

        return pl.pallas_call(
            _make_fused_kernel(num_layers, hidden_size, B),
            out_shape=jax.ShapeDtypeStruct((B, output_size), jnp.float32),
            scratch_shapes=[
                pltpu.VMEM((B * CHANNELS, 4 * H), jnp.float32),  # per-layer input projections
                pltpu.VMEM((B * CHANNELS, H), jnp.float32),      # hseq of layer l (input to l+1)
            ],
        )(*args)

    return jax.jit(forward)


# --------------------------- pure-JAX reference -------------------------------

def reference_forward(x, params):
    """f32 reference with exact PyTorch SimpleLSTM semantics (for validation)."""
    B = x.shape[0]
    patches = (x.reshape(B, 7, 4, 7, 4).transpose(0, 1, 3, 2, 4).reshape(B * 49, 16))
    conv = patches @ params["conv_w"].reshape(32, 16).T + params["conv_b"][None, :]
    x_tm = conv.reshape(B, 49, 32).transpose(0, 2, 1)        # time-major [T=B, N=32, 49]
    H = params["w_hh_0"].shape[1]
    h_seq = x_tm
    for l in range(params["num_layers"]):
        w_ih, w_hh = params[f"w_ih_{l}"], params[f"w_hh_{l}"]
        b = params[f"b_ih_{l}"] + params[f"b_hh_{l}"]
        h = jnp.zeros((32, H), jnp.float32)
        c = jnp.zeros((32, H), jnp.float32)
        outs = []
        for t in range(B):
            gates = h_seq[t] @ w_ih.T + h @ w_hh.T + b
            i = jax.nn.sigmoid(gates[:, 0 * H:1 * H])
            f = jax.nn.sigmoid(gates[:, 1 * H:2 * H])
            g = jnp.tanh(gates[:, 2 * H:3 * H])
            o = jax.nn.sigmoid(gates[:, 3 * H:4 * H])
            c = f * c + i * g
            h = o * jnp.tanh(c)
            outs.append(h)
        h_seq = jnp.stack(outs, axis=0)                       # [T, 32, H]
    last = h_seq[:, -1, :]                                    # torch out[-1, :, :] -> [B, H]
    return last @ params["fc_w"].T + params["fc_b"][None, :]


# ------------------------------ param init ------------------------------------

def init_params(key, hidden_size, output_size, num_layers):
    params = {"num_layers": num_layers}
    n_keys = 4 + 4 * num_layers
    keys = jax.random.split(key, n_keys)
    ki = iter(range(n_keys))

    params["conv_w"] = 0.1 * jax.random.normal(keys[next(ki)], (32, 1, 4, 4), jnp.float32)
    params["conv_b"] = 0.1 * jax.random.normal(keys[next(ki)], (32,), jnp.float32)

    in_size = 49
    for l in range(num_layers):
        params[f"w_ih_{l}"] = 0.1 * jax.random.normal(
            keys[next(ki)], (4 * hidden_size, in_size), jnp.float32)
        params[f"w_hh_{l}"] = 0.1 * jax.random.normal(
            keys[next(ki)], (4 * hidden_size, hidden_size), jnp.float32)
        params[f"b_ih_{l}"] = 0.01 * jnp.arange(4 * hidden_size, dtype=jnp.float32) / (4 * hidden_size)
        params[f"b_hh_{l}"] = jnp.zeros((4 * hidden_size,), jnp.float32)
        in_size = hidden_size

    params["fc_w"] = 0.1 * jax.random.normal(
        keys[next(ki)], (output_size, hidden_size), jnp.float32)
    params["fc_b"] = 0.1 * jax.random.normal(keys[next(ki)], (output_size,), jnp.float32)
    return params


# --------------------------------- main ---------------------------------------

if __name__ == "__main__":
    hidden_size = 32
    output_size = 10
    num_layers = 2
    batch = 2

    key = jax.random.PRNGKey(0)
    k_x, k_p = jax.random.split(key)
    x = jax.random.normal(k_x, (batch, 1, 28, 28), jnp.float32)
    params = init_params(k_p, hidden_size, output_size, num_layers)

    prep = prepare_params(params)                     # one-time weight prep
    forward = build_forward(num_layers, hidden_size, output_size)

    out = jax.block_until_ready(forward(x, prep))
    assert out.shape == (batch, output_size), out.shape

    # validate against an f32 pure-JAX reference (loose tol: bf16 matmul operands)
    ref = reference_forward(x, params)
    max_err = float(jnp.max(jnp.abs(out - ref)))
    assert max_err < 5e-2, max_err

    print("KERNEL_OK")
</pallas_src>

<mosaic_0001>
module attributes {stable_mosaic.version = 11 : i64} {
  func.func @kernel(%arg0: memref<32x49xbf16, #tpu.memory_space<vmem>>, %arg1: memref<32x16xbf16, #tpu.memory_space<vmem>>, %arg2: memref<49x128xbf16, #tpu.memory_space<vmem>>, %arg3: memref<32x128xbf16, #tpu.memory_space<vmem>>, %arg4: memref<32x128xf32, #tpu.memory_space<vmem>>, %arg5: memref<32x128xbf16, #tpu.memory_space<vmem>>, %arg6: memref<32x128xbf16, #tpu.memory_space<vmem>>, %arg7: memref<1x128xf32, #tpu.memory_space<vmem>>, %arg8: memref<32x10xbf16, #tpu.memory_space<vmem>>, %arg9: memref<1x10xf32, #tpu.memory_space<vmem>>, %arg10: memref<2x10xf32, #tpu.memory_space<vmem>>, %arg11: memref<64x128xf32, #tpu.memory_space<vmem>>, %arg12: memref<64x32xf32, #tpu.memory_space<vmem>>) attributes {dimension_semantics = [], scalar_prefetch = 0 : i64, scratch_operands = 2 : i64, tpu.core_type = #tpu.core_type<tc>} {
    %c0 = arith.constant 0 : index
    %c0_0 = arith.constant 0 : index
    %0 = vector.load %arg0[%c0, %c0_0] : memref<32x49xbf16, #tpu.memory_space<vmem>>, vector<32x49xbf16>
    %c0_1 = arith.constant 0 : index
    %c0_2 = arith.constant 0 : index
    %1 = vector.load %arg2[%c0_1, %c0_2] : memref<49x128xbf16, #tpu.memory_space<vmem>>, vector<49x128xbf16>
    %cst = arith.constant dense<0.000000e+00> : vector<32x128xf32>
    %2 = tpu.matmul %0, %1, %cst {dimension_numbers = #tpu.dot_dimension_numbers<[1], [0], [0], [1], [0, 0, 1, 1], [], []>} : vector<32x49xbf16>, vector<49x128xbf16>, vector<32x128xf32> -> vector<32x128xf32>
    %c0_3 = arith.constant 0 : index
    %c0_4 = arith.constant 0 : index
    %3 = vector.load %arg1[%c0_3, %c0_4] : memref<32x16xbf16, #tpu.memory_space<vmem>>, vector<32x16xbf16>
    %c0_5 = arith.constant 0 : index
    %c0_6 = arith.constant 0 : index
    %4 = vector.load %arg4[%c0_5, %c0_6] : memref<32x128xf32, #tpu.memory_space<vmem>>, vector<32x128xf32>
    %5 = vector.extract_strided_slice %2 {offsets = [0, 0], sizes = [16, 128], strides = [1, 1]} : vector<32x128xf32> to vector<16x128xf32>
    %6 = arith.truncf %5 : vector<16x128xf32> to vector<16x128xbf16>
    %cst_7 = arith.constant dense<0.000000e+00> : vector<32x128xf32>
    %7 = tpu.matmul %3, %6, %cst_7 {dimension_numbers = #tpu.dot_dimension_numbers<[1], [0], [0], [1], [0, 0, 1, 1], [], []>} : vector<32x16xbf16>, vector<16x128xbf16>, vector<32x128xf32> -> vector<32x128xf32>
    %8 = arith.addf %7, %4 : vector<32x128xf32>
    %c0_8 = arith.constant 0 : index
    %c0_9 = arith.constant 0 : index
    %9 = vector.load %arg11[%c0_8, %c0_9] : memref<64x128xf32, #tpu.memory_space<vmem>>, vector<32x128xf32>
    tpu.vector_store %arg11[%c0_8, %c0_9], %8 {strides = array<i32>} : memref<64x128xf32, #tpu.memory_space<vmem>>, vector<32x128xf32>,
    %10 = vector.extract_strided_slice %2 {offsets = [16, 0], sizes = [16, 128], strides = [1, 1]} : vector<32x128xf32> to vector<16x128xf32>
    %11 = arith.truncf %10 : vector<16x128xf32> to vector<16x128xbf16>
    %cst_10 = arith.constant dense<0.000000e+00> : vector<32x128xf32>
    %12 = tpu.matmul %3, %11, %cst_10 {dimension_numbers = #tpu.dot_dimension_numbers<[1], [0], [0], [1], [0, 0, 1, 1], [], []>} : vector<32x16xbf16>, vector<16x128xbf16>, vector<32x128xf32> -> vector<32x128xf32>
    %13 = arith.addf %12, %4 : vector<32x128xf32>
    %c32 = arith.constant 32 : index
    %c0_11 = arith.constant 0 : index
    %14 = vector.load %arg11[%c32, %c0_11] : memref<64x128xf32, #tpu.memory_space<vmem>>, vector<32x128xf32>
    tpu.vector_store %arg11[%c32, %c0_11], %13 {strides = array<i32>} : memref<64x128xf32, #tpu.memory_space<vmem>>, vector<32x128xf32>,
    %c0_12 = arith.constant 0 : index
    %c0_13 = arith.constant 0 : index
    %15 = vector.load %arg3[%c0_12, %c0_13] : memref<32x128xbf16, #tpu.memory_space<vmem>>, vector<32x128xbf16>
    %cst_14 = arith.constant 0.000000e+00 : f32
    %16 = vector.broadcast %cst_14 : f32 to vector<32x32xf32>
    %cst_15 = arith.constant 0.000000e+00 : f32
    %17 = vector.broadcast %cst_15 : f32 to vector<32x32xf32>
    %c0_16 = arith.constant 0 : index
    %c0_17 = arith.constant 0 : index
    %18 = vector.load %arg11[%c0_16, %c0_17] : memref<64x128xf32, #tpu.memory_space<vmem>>, vector<32x128xf32>
    %19 = arith.truncf %16 : vector<32x32xf32> to vector<32x32xbf16>
    %cst_18 = arith.constant dense<0.000000e+00> : vector<32x128xf32>
    %20 = tpu.matmul %19, %15, %cst_18 {dimension_numbers = #tpu.dot_dimension_numbers<[1], [0], [0], [1], [0, 0, 1, 1], [], []>} : vector<32x32xbf16>, vector<32x128xbf16>, vector<32x128xf32> -> vector<32x128xf32>
    %21 = arith.addf %18, %20 : vector<32x128xf32>
    %22 = vector.extract_strided_slice %21 {offsets = [0, 0], sizes = [32, 32], strides = [1, 1]} : vector<32x128xf32> to vector<32x32xf32>
    %23 = arith.negf %22 : vector<32x32xf32>
    %24 = math.exp %23 : vector<32x32xf32>
    %cst_19 = arith.constant 1.000000e+00 : f32
    %25 = vector.broadcast %cst_19 : f32 to vector<32x32xf32>
    %26 = arith.addf %25, %24 : vector<32x32xf32>
    %27 = arith.divf %25, %26 : vector<32x32xf32>
    %28 = vector.extract_strided_slice %21 {offsets = [0, 32], sizes = [32, 32], strides = [1, 1]} : vector<32x128xf32> to vector<32x32xf32>
    %29 = arith.negf %28 : vector<32x32xf32>
    %30 = math.exp %29 : vector<32x32xf32>
    %cst_20 = arith.constant 1.000000e+00 : f32
    %31 = vector.broadcast %cst_20 : f32 to vector<32x32xf32>
    %32 = arith.addf %31, %30 : vector<32x32xf32>
    %33 = arith.divf %31, %32 : vector<32x32xf32>
    %34 = vector.extract_strided_slice %21 {offsets = [0, 64], sizes = [32, 32], strides = [1, 1]} : vector<32x128xf32> to vector<32x32xf32>
    %35 = math.tanh %34 : vector<32x32xf32>
    %36 = vector.extract_strided_slice %21 {offsets = [0, 96], sizes = [32, 32], strides = [1, 1]} : vector<32x128xf32> to vector<32x32xf32>
    %37 = arith.negf %36 : vector<32x32xf32>
    %38 = math.exp %37 : vector<32x32xf32>
    %cst_21 = arith.constant 1.000000e+00 : f32
    %39 = vector.broadcast %cst_21 : f32 to vector<32x32xf32>
    %40 = arith.addf %39, %38 : vector<32x32xf32>
    %41 = arith.divf %39, %40 : vector<32x32xf32>
    %42 = arith.mulf %33, %17 : vector<32x32xf32>
    %43 = arith.mulf %27, %35 : vector<32x32xf32>
    %44 = arith.addf %42, %43 : vector<32x32xf32>
    %45 = math.tanh %44 : vector<32x32xf32>
    %46 = arith.mulf %41, %45 : vector<32x32xf32>
    %c0_22 = arith.constant 0 : index
    %c0_23 = arith.constant 0 : index
    %47 = vector.load %arg12[%c0_22, %c0_23] : memref<64x32xf32, #tpu.memory_space<vmem>>, vector<32x32xf32>
    tpu.vector_store %arg12[%c0_22, %c0_23], %46 {strides = array<i32>} : memref<64x32xf32, #tpu.memory_space<vmem>>, vector<32x32xf32>,
    %c32_24 = arith.constant 32 : index
    %c0_25 = arith.constant 0 : index
    %48 = vector.load %arg11[%c32_24, %c0_25] : memref<64x128xf32, #tpu.memory_space<vmem>>, vector<32x128xf32>
    %49 = arith.truncf %46 : vector<32x32xf32> to vector<32x32xbf16>
    %cst_26 = arith.constant dense<0.000000e+00> : vector<32x128xf32>
    %50 = tpu.matmul %49, %15, %cst_26 {dimension_numbers = #tpu.dot_dimension_numbers<[1], [0], [0], [1], [0, 0, 1, 1], [], []>} : vector<32x32xbf16>, vector<32x128xbf16>, vector<32x128xf32> -> vector<32x128xf32>
    %51 = arith.addf %48, %50 : vector<32x128xf32>
    %52 = vector.extract_strided_slice %51 {offsets = [0, 0], sizes = [32, 32], strides = [1, 1]} : vector<32x128xf32> to vector<32x32xf32>
    %53 = arith.negf %52 : vector<32x32xf32>
    %54 = math.exp %53 : vector<32x32xf32>
    %cst_27 = arith.constant 1.000000e+00 : f32
    %55 = vector.broadcast %cst_27 : f32 to vector<32x32xf32>
    %56 = arith.addf %55, %54 : vector<32x32xf32>
    %57 = arith.divf %55, %56 : vector<32x32xf32>
    %58 = vector.extract_strided_slice %51 {offsets = [0, 32], sizes = [32, 32], strides = [1, 1]} : vector<32x128xf32> to vector<32x32xf32>
    %59 = arith.negf %58 : vector<32x32xf32>
    %60 = math.exp %59 : vector<32x32xf32>
    %cst_28 = arith.constant 1.000000e+00 : f32
    %61 = vector.broadcast %cst_28 : f32 to vector<32x32xf32>
    %62 = arith.addf %61, %60 : vector<32x32xf32>
    %63 = arith.divf %61, %62 : vector<32x32xf32>
    %64 = vector.extract_strided_slice %51 {offsets = [0, 64], sizes = [32, 32], strides = [1, 1]} : vector<32x128xf32> to vector<32x32xf32>
    %65 = math.tanh %64 : vector<32x32xf32>
    %66 = vector.extract_strided_slice %51 {offsets = [0, 96], sizes = [32, 32], strides = [1, 1]} : vector<32x128xf32> to vector<32x32xf32>
    %67 = arith.negf %66 : vector<32x32xf32>
    %68 = math.exp %67 : vector<32x32xf32>
    %cst_29 = arith.constant 1.000000e+00 : f32
    %69 = vector.broadcast %cst_29 : f32 to vector<32x32xf32>
    %70 = arith.addf %69, %68 : vector<32x32xf32>
    %71 = arith.divf %69, %70 : vector<32x32xf32>
    %72 = arith.mulf %63, %44 : vector<32x32xf32>
    %73 = arith.mulf %57, %65 : vector<32x32xf32>
    %74 = arith.addf %72, %73 : vector<32x32xf32>
    %75 = math.tanh %74 : vector<32x32xf32>
    %76 = arith.mulf %71, %75 : vector<32x32xf32>
    %c32_30 = arith.constant 32 : index
    %c0_31 = arith.constant 0 : index
    %77 = vector.load %arg12[%c32_30, %c0_31] : memref<64x32xf32, #tpu.memory_space<vmem>>, vector<32x32xf32>
    tpu.vector_store %arg12[%c32_30, %c0_31], %76 {strides = array<i32>} : memref<64x32xf32, #tpu.memory_space<vmem>>, vector<32x32xf32>,
    %c0_32 = arith.constant 0 : index
    %c0_33 = arith.constant 0 : index
    %78 = vector.load %arg12[%c0_32, %c0_33] : memref<64x32xf32, #tpu.memory_space<vmem>>, vector<64x32xf32>
    %79 = arith.truncf %78 : vector<64x32xf32> to vector<64x32xbf16>
    %c0_34 = arith.constant 0 : index
    %c0_35 = arith.constant 0 : index
    %80 = vector.load %arg5[%c0_34, %c0_35] : memref<32x128xbf16, #tpu.memory_space<vmem>>, vector<32x128xbf16>
    %cst_36 = arith.constant dense<0.000000e+00> : vector<64x128xf32>
    %81 = tpu.matmul %79, %80, %cst_36 {dimension_numbers = #tpu.dot_dimension_numbers<[1], [0], [0], [1], [0, 0, 1, 1], [], []>} : vector<64x32xbf16>, vector<32x128xbf16>, vector<64x128xf32> -> vector<64x128xf32>
    %c0_37 = arith.constant 0 : index
    %c0_38 = arith.constant 0 : index
    %82 = vector.load %arg7[%c0_37, %c0_38] : memref<1x128xf32, #tpu.memory_space<vmem>>, vector<1x128xf32>
    %83 = vector.broadcast %82 : vector<1x128xf32> to vector<64x128xf32>
    %84 = arith.addf %81, %83 : vector<64x128xf32>
    %c0_39 = arith.constant 0 : index
    %c0_40 = arith.constant 0 : index
    %85 = vector.load %arg11[%c0_39, %c0_40] : memref<64x128xf32, #tpu.memory_space<vmem>>, vector<64x128xf32>
    tpu.vector_store %arg11[%c0_39, %c0_40], %84 {strides = array<i32>} : memref<64x128xf32, #tpu.memory_space<vmem>>, vector<64x128xf32>,
    %c0_41 = arith.constant 0 : index
    %c0_42 = arith.constant 0 : index
    %86 = vector.load %arg6[%c0_41, %c0_42] : memref<32x128xbf16, #tpu.memory_space<vmem>>, vector<32x128xbf16>
    %cst_43 = arith.constant 0.000000e+00 : f32
    %87 = vector.broadcast %cst_43 : f32 to vector<32x32xf32>
    %cst_44 = arith.constant 0.000000e+00 : f32
    %88 = vector.broadcast %cst_44 : f32 to vector<32x32xf32>
    %c0_45 = arith.constant 0 : index
    %c0_46 = arith.constant 0 : index
    %89 = vector.load %arg11[%c0_45, %c0_46] : memref<64x128xf32, #tpu.memory_space<vmem>>, vector<32x128xf32>
    %90 = arith.truncf %87 : vector<32x32xf32> to vector<32x32xbf16>
    %cst_47 = arith.constant dense<0.000000e+00> : vector<32x128xf32>
    %91 = tpu.matmul %90, %86, %cst_47 {dimension_numbers = #tpu.dot_dimension_numbers<[1], [0], [0], [1], [0, 0, 1, 1], [], []>} : vector<32x32xbf16>, vector<32x128xbf16>, vector<32x128xf32> -> vector<32x128xf32>
    %92 = arith.addf %89, %91 : vector<32x128xf32>
    %93 = vector.extract_strided_slice %92 {offsets = [0, 0], sizes = [32, 32], strides = [1, 1]} : vector<32x128xf32> to vector<32x32xf32>
    %94 = arith.negf %93 : vector<32x32xf32>
    %95 = math.exp %94 : vector<32x32xf32>
    %cst_48 = arith.constant 1.000000e+00 : f32
    %96 = vector.broadcast %cst_48 : f32 to vector<32x32xf32>
    %97 = arith.addf %96, %95 : vector<32x32xf32>
    %98 = arith.divf %96, %97 : vector<32x32xf32>
    %99 = vector.extract_strided_slice %92 {offsets = [0, 32], sizes = [32, 32], strides = [1, 1]} : vector<32x128xf32> to vector<32x32xf32>
    %100 = arith.negf %99 : vector<32x32xf32>
    %101 = math.exp %100 : vector<32x32xf32>
    %cst_49 = arith.constant 1.000000e+00 : f32
    %102 = vector.broadcast %cst_49 : f32 to vector<32x32xf32>
    %103 = arith.addf %102, %101 : vector<32x32xf32>
    %104 = arith.divf %102, %103 : vector<32x32xf32>
    %105 = vector.extract_strided_slice %92 {offsets = [0, 64], sizes = [32, 32], strides = [1, 1]} : vector<32x128xf32> to vector<32x32xf32>
    %106 = math.tanh %105 : vector<32x32xf32>
    %107 = vector.extract_strided_slice %92 {offsets = [0, 96], sizes = [32, 32], strides = [1, 1]} : vector<32x128xf32> to vector<32x32xf32>
    %108 = arith.negf %107 : vector<32x32xf32>
    %109 = math.exp %108 : vector<32x32xf32>
    %cst_50 = arith.constant 1.000000e+00 : f32
    %110 = vector.broadcast %cst_50 : f32 to vector<32x32xf32>
    %111 = arith.addf %110, %109 : vector<32x32xf32>
    %112 = arith.divf %110, %111 : vector<32x32xf32>
    %113 = arith.mulf %104, %88 : vector<32x32xf32>
    %114 = arith.mulf %98, %106 : vector<32x32xf32>
    %115 = arith.addf %113, %114 : vector<32x32xf32>
    %116 = math.tanh %115 : vector<32x32xf32>
    %117 = arith.mulf %112, %116 : vector<32x32xf32>
    %118 = vector.extract_strided_slice %117 {offsets = [31, 0], sizes = [1, 32], strides = [1, 1]} : vector<32x32xf32> to vector<1x32xf32>
    %c32_51 = arith.constant 32 : index
    %c0_52 = arith.constant 0 : index
    %119 = vector.load %arg11[%c32_51, %c0_52] : memref<64x128xf32, #tpu.memory_space<vmem>>, vector<32x128xf32>
    %120 = arith.truncf %117 : vector<32x32xf32> to vector<32x32xbf16>
    %cst_53 = arith.constant dense<0.000000e+00> : vector<32x128xf32>
    %121 = tpu.matmul %120, %86, %cst_53 {dimension_numbers = #tpu.dot_dimension_numbers<[1], [0], [0], [1], [0, 0, 1, 1], [], []>} : vector<32x32xbf16>, vector<32x128xbf16>, vector<32x128xf32> -> vector<32x128xf32>
    %122 = arith.addf %119, %121 : vector<32x128xf32>
    %123 = vector.extract_strided_slice %122 {offsets = [0, 0], sizes = [32, 32], strides = [1, 1]} : vector<32x128xf32> to vector<32x32xf32>
    %124 = arith.negf %123 : vector<32x32xf32>
    %125 = math.exp %124 : vector<32x32xf32>
    %cst_54 = arith.constant 1.000000e+00 : f32
    %126 = vector.broadcast %cst_54 : f32 to vector<32x32xf32>
    %127 = arith.addf %126, %125 : vector<32x32xf32>
    %128 = arith.divf %126, %127 : vector<32x32xf32>
    %129 = vector.extract_strided_slice %122 {offsets = [0, 32], sizes = [32, 32], strides = [1, 1]} : vector<32x128xf32> to vector<32x32xf32>
    %130 = arith.negf %129 : vector<32x32xf32>
    %131 = math.exp %130 : vector<32x32xf32>
    %cst_55 = arith.constant 1.000000e+00 : f32
    %132 = vector.broadcast %cst_55 : f32 to vector<32x32xf32>
    %133 = arith.addf %132, %131 : vector<32x32xf32>
    %134 = arith.divf %132, %133 : vector<32x32xf32>
    %135 = vector.extract_strided_slice %122 {offsets = [0, 64], sizes = [32, 32], strides = [1, 1]} : vector<32x128xf32> to vector<32x32xf32>
    %136 = math.tanh %135 : vector<32x32xf32>
    %137 = vector.extract_strided_slice %122 {offsets = [0, 96], sizes = [32, 32], strides = [1, 1]} : vector<32x128xf32> to vector<32x32xf32>
    %138 = arith.negf %137 : vector<32x32xf32>
    %139 = math.exp %138 : vector<32x32xf32>
    %cst_56 = arith.constant 1.000000e+00 : f32
    %140 = vector.broadcast %cst_56 : f32 to vector<32x32xf32>
    %141 = arith.addf %140, %139 : vector<32x32xf32>
    %142 = arith.divf %140, %141 : vector<32x32xf32>
    %143 = arith.mulf %134, %115 : vector<32x32xf32>
    %144 = arith.mulf %128, %136 : vector<32x32xf32>
    %145 = arith.addf %143, %144 : vector<32x32xf32>
    %146 = math.tanh %145 : vector<32x32xf32>
    %147 = arith.mulf %142, %146 : vector<32x32xf32>
    %148 = vector.extract_strided_slice %147 {offsets = [31, 0], sizes = [1, 32], strides = [1, 1]} : vector<32x32xf32> to vector<1x32xf32>
    %149 = tpu.concatenate %118, %148 in 0 : vector<1x32xf32>, vector<1x32xf32> -> vector<2x32xf32>
    %150 = arith.truncf %149 : vector<2x32xf32> to vector<2x32xbf16>
    %c0_57 = arith.constant 0 : index
    %c0_58 = arith.constant 0 : index
    %151 = vector.load %arg8[%c0_57, %c0_58] : memref<32x10xbf16, #tpu.memory_space<vmem>>, vector<32x10xbf16>
    %cst_59 = arith.constant dense<0.000000e+00> : vector<2x10xf32>
    %152 = tpu.matmul %150, %151, %cst_59 {dimension_numbers = #tpu.dot_dimension_numbers<[1], [0], [0], [1], [0, 0, 1, 1], [], []>} : vector<2x32xbf16>, vector<32x10xbf16>, vector<2x10xf32> -> vector<2x10xf32>
    %c0_60 = arith.constant 0 : index
    %c0_61 = arith.constant 0 : index
    %153 = vector.load %arg9[%c0_60, %c0_61] : memref<1x10xf32, #tpu.memory_space<vmem>>, vector<1x10xf32>
    %154 = vector.broadcast %153 : vector<1x10xf32> to vector<2x10xf32>
    %155 = arith.addf %152, %154 : vector<2x10xf32>
    %c0_62 = arith.constant 0 : index
    %c0_63 = arith.constant 0 : index
    %156 = vector.load %arg10[%c0_62, %c0_63] : memref<2x10xf32, #tpu.memory_space<vmem>>, vector<2x10xf32>
    tpu.vector_store %arg10[%c0_62, %c0_63], %155 {strides = array<i32>} : memref<2x10xf32, #tpu.memory_space<vmem>>, vector<2x10xf32>,
    return
  }
}

</mosaic_0001>

<bundles_post_ra>
// kernel: forward.1
= control target key start
LH: loop header
LB: loop body
LE: loop exit
PB: predicated region body
PF: predicated region fallthrough
CT: control target
= control target key end

     0   :  { %vm86_vm0 = vcmask 1040384   ;;  %v1254_v2 = vmov 0   ;;  %s1573_s0 = inlined_call_operand.vmem [shape: bf16[32,49], index: 0, kind: input, shape index: {}]   ;;  %s1574_s1 = inlined_call_operand.vmem [shape: bf16[32,16], index: 1, kind: input, shape index: {}]   ;;  %s1575_s2 = inlined_call_operand.vmem [shape: bf16[49,128], index: 2, kind: input, shape index: {}]   ;;  %s1576_s3 = inlined_call_operand.vmem [shape: bf16[32,128], index: 3, kind: input, shape index: {}]   ;;  %s1577_s4 = inlined_call_operand.vmem [shape: f32[32,128], index: 4, kind: input, shape index: {}]   ;;  %s1578_s5 = inlined_call_operand.vmem [shape: bf16[32,128], index: 5, kind: input, shape index: {}]   ;;  %s1579_s6 = inlined_call_operand.vmem [shape: bf16[32,128], index: 6, kind: input, shape index: {}]   ;;  %s1580_s7 = inlined_call_operand.vmem [shape: f32[1,128], index: 7, kind: input, shape index: {}]   ;;  %s1581_s8 = inlined_call_operand.vmem [shape: bf16[32,10], index: 8, kind: input, shape index: {}]   ;;  %s1582_s9 = inlined_call_operand.vmem [shape: f32[1,10], index: 9, kind: input, shape index: {}]   ;;  %s1583_s10 = inlined_call_operand.hbm [shape: f32[2,10], index: 10, kind: output, shape index: {}]  }
   0x1   :  { %v47_v0 = vld [vmem:[%s1575_s2 + $0x18] sm:$0x1]  ;;  %v88_v3 = vsel %vm86_vm0, 65535, %v1254_v2 }
   0x2   :  { %v71_v1 = vunpack.c.l.b16 %v47_v0 }
   0x3   :  { %15 = vsyncpa [#allocation5], 0  ;;  %v1106_v6 = vld [vmem:[%s1575_s2 + $0x10] sm:$0xff]  ;;  %v1105_v7 = vld [vmem:[%s1575_s2 + $0x8] sm:$0xff]  ;;  %vm79_vm1 = vcmask 400384   ;;  %vm130_vm2 = vcmask 130048  }
   0x4   :  { %v75_v4 = vpack.c.b16 %v71_v1, %v71_v1  ;;  %v1104_v8 = vld [vmem:[%s1575_s2] sm:$0xff]  ;;  %v1103_v10 = vld [vmem:[%s1573_s0 + $0x8] sm:$0xff]  ;;  %v117_v21 = vld [vmem:[%s1577_s4 + $0x10] sm:$0xff]  ;;  %s1255_s17 = smov 64   ;;  %s1005_s11 = sshll.u32 %s1583_s10, 4  ;;  %s1006_s11 = int_to_ptr.hbm [resolvable:$true] %s1005_s11 }
   0x5   :  { %v1102_v9 = vld [vmem:[%s1573_s0] sm:$0xff]  ;;  %v1110_v14 = vld [vmem:[%s1576_s3 + $0x8] sm:$0xff]  ;;  %v118_v25 = vld [vmem:[%s1577_s4 + $0x18] sm:$0xff]  ;;  %s1257_s0 = smov [#allocation4]  }
   0x6   :  { %v90_v5 = vand.u32 %v88_v3, %v75_v4  ;;  %v1107_v15 = vld [vmem:[%s1574_s1] sm:$0xff]  ;;  %v1108_v20 = vld [vmem:[%s1574_s1 + $0x8] sm:$0xff] }
   0x7   :  { %v1109_v16 = vld [vmem:[%s1576_s3] sm:$0xff]  ;;  %v1366_v33 = vld [vmem:[%s1577_s4 + $0x8] sm:$0xff] }
   0x8   :  { %96 = vmatpush.bf16.msra.mxu0 %v90_v5  ;;  %v1360_v28 = vld [vmem:[%s1577_s4] sm:$0xff]  ;;  %s1256_s4 = smov 32  }
   0xc   :  { %97 = vmatpush.bf16.msra.mxu0 %v1106_v6 }
  0x10   :  { %98 = vmatpush.bf16.msra.mxu0 %v1105_v7 }
  0x14   :  { %99 = vmatpush.bf16.msra.mxu0 %v1104_v8 }
  0x17   :  { %1034 = vmatmul.msk.bf16.vlgmr.msra.gmra.mxu0 %vm79_vm1, %v1102_v9 }
  0x27   :  { %1035 = vmatmul.msk.bf16.gmra.mxu0 %vm79_vm1, %v1103_v10 }
  0x94   :  { %v101_v11 = vpop.f32.mrf.mxu0 }
  0x9c   :  { %v103_v12 = vpop.f32.mrf.mxu0 }
  0x9d   :  { %v119_v13 = vpack.c.bf16 %v103_v12, %v101_v11 }
  0x9f   :  { %144 = vmatpush.bf16.msra.mxu1 %v119_v13 }
  0xa2   :  { %1044 = vmatmul.msk.bf16.vlgmr.msra.gmra.mxu1 %vm130_vm2, %v1107_v15 }
  0xa3   :  { %423 = vmatpush.bf16.msrb.mxu1 %v1110_v14 }
  0xa4   :  { %v106_v17 = vpop.f32.mrf.mxu0 }
  0xa7   :  { %424 = vmatpush.bf16.msrb.mxu1 %v1109_v16 }
  0xac   :  { %v108_v18 = vpop.f32.mrf.mxu0 }
  0xad   :  { %v160_v19 = vpack.c.bf16 %v108_v18, %v106_v17 }
  0xaf   :  { %168 = vmatpush.bf16.msra.mxu2 %v160_v19  ;;  %1117 = vmatpush.bf16.msra.mxu3 %v160_v19 }
  0xb2   :  { %1047 = vmatmul.msk.bf16.vlgmr.msra.gmra.mxu3 %vm130_vm2, %v1108_v20  ;;  %1045 = vmatmul.msk.bf16.gmra.mxu1 %vm130_vm2, %v1108_v20 }
  0xb3   :  { %214 = vmatpush.bf16.msrb.mxu3 %v1110_v14  ;;  %1046 = vmatmul.msk.bf16.vlgmr.msra.gmra.mxu2 %vm130_vm2, %v1107_v15 }
  0xb7   :  { %215 = vmatpush.bf16.msrb.mxu3 %v1109_v16 }
  0xc2   :  { %216 = vmatmul.bf16.vlgmr.msrb.gmra.mxu3 %v1254_v2 }
  0xd2   :  { %221 = vmatmul.bf16.gmra.mxu3 %v1254_v2 }
 0x11f   :  { %v146_v24 = vpop.f32.mrf.mxu1 }
 0x120   :  { %v147_v29 = vadd.f32 %v146_v24, %v1360_v28 }
 0x127   :  { %v148_v30 = vpop.f32.mrf.mxu1 }
 0x128   :  { %v149_v34 = vadd.f32 %v148_v30, %v1366_v33 }
 0x12f   :  { %v151_v36 = vpop.f32.mrf.mxu1 }
 0x130   :  { %v152_v39 = vadd.f32 %v151_v36, %v117_v21 }
 0x135   :  { %v175_v22 = vpop.f32.mrf.mxu3 }
 0x136   :  { %v1350_v23 = vadd.f32 %v175_v22, %v117_v21 }
 0x137   :  { %v153_v43 = vpop.f32.mrf.mxu1 }
 0x138   :  { %v154_v44 = vadd.f32 %v153_v43, %v118_v25 }
 0x13d   :  { %v177_v26 = vpop.f32.mrf.mxu3 }
 0x13e   :  { %v1355_v27 = vadd.f32 %v177_v26, %v118_v25 }
 0x145   :  { %v217_v31 = vpop.f32.mrf.mxu3 }
 0x146   :  { %v227_v32 = vadd.f32 %v217_v31, %v147_v29 }
 0x148   :  { %1124 = vtanh.f32 %v227_v32  ;;  %v1056_v49 = vmul.f32 -1.442695, %v227_v32 }
 0x14d   :  { %v219_v35 = vpop.f32.mrf.mxu3 }
 0x14e   :  { %v1125_v37 = vpop.eup %1124  ;;  %v228_v38 = vadd.f32 %v219_v35, %v149_v34 }
 0x14f   :  { %319 = vrot.lane.b32.xlu0 %v1125_v37, %s1255_s17 }
 0x150   :  { %1126 = vtanh.f32 %v228_v38  ;;  %v1057_v50 = vmul.f32 -1.442695, %v228_v38 }
 0x155   :  { %v222_v40 = vpop.f32.mrf.mxu3 }
 0x156   :  { %v1127_v41 = vpop.eup %1126  ;;  %v229_v42 = vadd.f32 %v222_v40, %v152_v39 }
 0x157   :  { %321 = vrot.lane.b32.xlu0 %v1127_v41, %s1255_s17 }
 0x158   :  { %1128 = vtanh.f32 %v229_v42  ;;  %v1058_v53 = vmul.f32 -1.442695, %v229_v42 }
 0x15d   :  { %v224_v45 = vpop.f32.mrf.mxu3 }
 0x15e   :  { %v1129_v46 = vpop.eup %1128  ;;  %v230_v47 = vadd.f32 %v224_v45, %v154_v44 }
 0x15f   :  { %323 = vrot.lane.b32.xlu1 %v1129_v46, %s1255_s17 }
 0x160   :  { %1130 = vtanh.f32 %v230_v47  ;;  %v1059_v57 = vmul.f32 -1.442695, %v230_v47 }
 0x161   :  { %1132 = vpow2.f32 %v1056_v49 }
 0x162   :  { %1134 = vpow2.f32 %v1057_v50 }
 0x166   :  { %v1131_v48 = vpop.eup %1130 }
 0x167   :  { %325 = vrot.lane.b32.xlu1 %v1131_v48, %s1255_s17  ;;  %v1133_v51 = vpop.eup %1132 }
 0x168   :  { %v243_v52 = vadd.f32 1.0, %v1133_v51  ;;  %v1135_v54 = vpop.eup %1134 }
 0x169   :  { %v244_v55 = vadd.f32 1.0, %v1135_v54 }
 0x16a   :  { %1136 = vrcp.f32 %v243_v52  ;;  %v258_v7 = vand.u32 2147483648, %v243_v52  ;;  %vm252_vm4 = vweird.f32 %v243_v52  ;;  %v256_v8 = vand.u32 2147483647, %v243_v52 }
 0x16b   :  { %1138 = vpow2.f32 %v1058_v53  ;;  %v273_v19 = vand.u32 2147483648, %v244_v55  ;;  %vm267_vm8 = vweird.f32 %v244_v55  ;;  %v271_v20 = vand.u32 2147483647, %v244_v55 }
 0x16c   :  { %1140 = vrcp.f32 %v244_v55  ;;  %v259_v12 = vor.u32 1.1754944e-38, %v258_v7  ;;  %vm257_vm6 = vcmp.eq.f32.partialorder %v256_v8, 8.507059e+37 }
 0x16d   :  { %1142 = vpow2.f32 %v1059_v57  ;;  %v274_v25 = vor.u32 1.1754944e-38, %v273_v19  ;;  %vm272_vm10 = vcmp.eq.f32.partialorder %v271_v20, 8.507059e+37 }
 0x170   :  { %v1137_v56 = vpop.eup %1136 }
 0x171   :  { %v1139_v58 = vpop.eup %1138  ;;  %v248_v59 = vmul.f32 %v1137_v56, %v243_v52  ;;  %vm253_vm3 = vweird.f32 %v1137_v56 }
 0x172   :  { %v245_v60 = vadd.f32 1.0, %v1139_v58  ;;  %v1141_v62 = vpop.eup %1140  ;;  %vm254_vm5 = vmor %vm252_vm4, %vm253_vm3  ;;  %vm204_vm4 = vcmask 261120  }
 0x173   :  { %v249_v61 = vsub.f32 1.0, %v248_v59  ;;  %v1143_v63 = vpop.eup %1142  ;;  %v263_v1 = vmul.f32 %v1141_v62, %v244_v55  ;;  %vm268_vm7 = vweird.f32 %v1141_v62 }
 0x174   :  { %1144 = vrcp.f32 %v245_v60  ;;  %v246_v3 = vadd.f32 1.0, %v1143_v63  ;;  %vm269_vm9 = vmor %vm267_vm8, %vm268_vm7  ;;  %vm282_vm11 = vweird.f32 %v245_v60  ;;  %v288_v34 = vand.u32 2147483648, %v245_v60 }
 0x175   :  { %v250_v0 = vmul.f32 %v1137_v56, %v249_v61  ;;  %v264_v5 = vsub.f32 1.0, %v263_v1  ;;  %v286_v35 = vand.u32 2147483647, %v245_v60 }
 0x176   :  { %1146 = vrcp.f32 %v246_v3  ;;  %v289_v38 = vor.u32 1.1754944e-38, %v288_v34  ;;  %v303_v43 = vand.u32 2147483648, %v246_v3  ;;  %vm297_vm1 = vweird.f32 %v246_v3 }
 0x177   :  { %v251_v4 = vadd.f32 %v1137_v56, %v250_v0  ;;  %v265_v10 = vmul.f32 %v1141_v62, %v264_v5  ;;  %vm287_vm14 = vcmp.eq.f32.partialorder %v286_v35, 8.507059e+37  ;;  %v301_v44 = vand.u32 2147483647, %v246_v3 }
 0x178   :  { %v304_v46 = vor.u32 1.1754944e-38, %v303_v43 }
 0x179   :  { %v255_v9 = vsel %vm254_vm5, %v1137_v56, %v251_v4  ;;  %v266_v16 = vadd.f32 %v1141_v62, %v265_v10  ;;  %vm302_vm3 = vcmp.eq.f32.partialorder %v301_v44, 8.507059e+37 }
 0x17a   :  { %v1145_v6 = vpop.eup %1144  ;;  %v1373_v14 = vsel %vm257_vm6, %v259_v12, %v255_v9 }
 0x17b   :  { %v278_v11 = vmul.f32 %v1145_v6, %v245_v60  ;;  %v270_v21 = vsel %vm269_vm9, %v1141_v62, %v266_v16  ;;  %vm283_vm12 = vweird.f32 %v1145_v6  ;;  %v311_v50 = vmul.f32 0.0, %v1373_v14 }
 0x17c   :  { %v1147_v18 = vpop.eup %1146  ;;  %v275_v29 = vsel %vm272_vm10, %v274_v25, %v270_v21  ;;  %vm284_vm13 = vmor %vm282_vm11, %vm283_vm12 }
 0x17d   :  { %v279_v17 = vsub.f32 1.0, %v278_v11  ;;  %v293_v24 = vmul.f32 %v1147_v18, %v246_v3  ;;  %vm298_vm15 = vweird.f32 %v1147_v18  ;;  %v312_v53 = vmul.f32 0.0, %v275_v29 }
 0x17e   :  { %vm299_vm2 = vmor %vm297_vm1, %vm298_vm15 }
 0x17f   :  { %v280_v22 = vmul.f32 %v1145_v6, %v279_v17  ;;  %v294_v32 = vsub.f32 1.0, %v293_v24  ;;  %v1111_v17 = vld [vmem:[%s1578_s5] sm:$0xff] }
 0x181   :  { %v281_v31 = vadd.f32 %v1145_v6, %v280_v22  ;;  %v295_v37 = vmul.f32 %v1147_v18, %v294_v32 }
 0x183   :  { %v285_v36 = vsel %vm284_vm13, %v1145_v6, %v281_v31  ;;  %v296_v42 = vadd.f32 %v1147_v18, %v295_v37  ;;  %v170_v31 = vpop.f32.mrf.mxu2 }
 0x184   :  { %v290_v40 = vsel %vm287_vm14, %v289_v38, %v285_v36  ;;  %v171_v32 = vadd.f32 %v170_v31, %v1360_v28  ;;  %v1434_v28 = vld [vmem:[%s1580_s7] ss:$0 sm:$0xff] }
 0x185   :  { %v300_v45 = vsel %vm299_vm2, %v1147_v18, %v296_v42  ;;  %v313_v58 = vmul.f32 0.0, %v290_v40 }
 0x186   :  { %v305_v48 = vsel %vm302_vm3, %v304_v46, %v300_v45 }
 0x187   :  { %v314_v61 = vmul.f32 0.0, %v305_v48 }
 0x18b   :  { %v172_v36 = vpop.f32.mrf.mxu2 }
 0x18c   :  { %v173_v37 = vadd.f32 %v172_v36, %v1366_v33 }
 0x1c1   :  { %v320_v13 = vpop.permute.xlu0 %319 }
 0x1c2   :  { %v331_v15 = vmul.f32 %v320_v13, %v1373_v14  ;;  %v1114_v13 = vld [vmem:[%s1579_s6 + $0x8] sm:$0xff] }
 0x1c3   :  { %715 = vmatpush.bf16.msra.mxu3 %v1114_v13  ;;  %901 = vmatpush.bf16.msrb.mxu0 %v1114_v13 }
 0x1c4   :  { %339 = vrot.lane.b32.xlu2 %v331_v15, %s1256_s4  ;;  %v1113_v15 = vld [vmem:[%s1579_s6] sm:$0xff] }
 0x1c7   :  { %716 = vmatpush.bf16.msra.mxu3 %v1113_v15  ;;  %902 = vmatpush.bf16.msrb.mxu0 %v1113_v15 }
 0x1c9   :  { %v322_v26 = vpop.permute.xlu0 %321 }
 0x1ca   :  { %v332_v30 = vmul.f32 %v322_v26, %v275_v29  ;;  %717 = vmatmul.bf16.vlgmr.msra.gmra.mxu3 %v1254_v2 }
 0x1cc   :  { %341 = vrot.lane.b32.xlu2 %v332_v30, %s1256_s4 }
 0x1d1   :  { %v324_v39 = vpop.permute.xlu1 %323 }
 0x1d2   :  { %v333_v41 = vmul.f32 %v324_v39, %v290_v40 }
 0x1d4   :  { %343 = vrot.lane.b32.xlu0 %v333_v41, %s1256_s4 }
 0x1d9   :  { %v326_v47 = vpop.permute.xlu1 %325 }
 0x1da   :  { %v334_v49 = vmul.f32 %v326_v47, %v305_v48  ;;  %722 = vmatmul.bf16.gmra.mxu3 %v1254_v2 }
 0x1dc   :  { %345 = vrot.lane.b32.xlu1 %v334_v49, %s1256_s4 }
 0x21e   :  { %v340_v51 = vpop.permute.xlu2 %339 }
 0x21f   :  { %v1381_v52 = vadd.f32 %v340_v51, %v311_v50 }
 0x221   :  { %1148 = vtanh.f32 %v1381_v52 }
 0x226   :  { %v342_v54 = vpop.permute.xlu2 %341 }
 0x227   :  { %v1149_v55 = vpop.eup %1148  ;;  %v1384_v56 = vadd.f32 %v342_v54, %v312_v53 }
 0x228   :  { %363 = vrot.lane.b32.xlu2 %v1149_v55, %s1255_s17 }
 0x229   :  { %1150 = vtanh.f32 %v1384_v56 }
 0x22f   :  { %v1151_v57 = vpop.eup %1150 }
 0x230   :  { %365 = vrot.lane.b32.xlu0 %v1151_v57, %s1255_s17 }
 0x246   :  { %v344_v59 = vpop.permute.xlu0 %343 }
 0x247   :  { %v1389_v60 = vadd.f32 %v344_v59, %v313_v58 }
 0x249   :  { %1152 = vtanh.f32 %v1389_v60 }
 0x24d   :  { %v718_v44 = vpop.f32.mrf.mxu3 }
 0x24e   :  { %v346_v62 = vpop.permute.xlu1 %345 }
 0x24f   :  { %v1153_v63 = vpop.eup %1152  ;;  %v1392_v0 = vadd.f32 %v346_v62, %v314_v61 }
 0x250   :  { %367 = vrot.lane.b32.xlu1 %v1153_v63, %s1255_s17 }
 0x251   :  { %1154 = vtanh.f32 %v1392_v0 }
 0x255   :  { %v720_v51 = vpop.f32.mrf.mxu3 }
 0x257   :  { %v1155_v1 = vpop.eup %1154 }
 0x258   :  { %369 = vrot.lane.b32.xlu2 %v1155_v1, %s1255_s17 }
 0x282   :  { %v364_v3 = vpop.permute.xlu2 %363 }
 0x283   :  { %v375_v4 = vmul.f32 %v364_v3, %v1373_v14  ;;  %v1112_v14 = vld [vmem:[%s1578_s5 + $0x8] sm:$0xff] }
 0x284   :  { %658 = vmatpush.bf16.msrb.mxu2 %v1112_v14 }
 0x285   :  { %383 = vrot.lane.b32.xlu0 %v375_v4, %s1256_s4 }
 0x288   :  { %659 = vmatpush.bf16.msrb.mxu2 %v1111_v17 }
 0x2a2   :  { %v366_v5 = vpop.permute.xlu0 %365 }
 0x2a3   :  { %v376_v6 = vmul.f32 %v366_v5, %v275_v29 }
 0x2a5   :  { %v403_v7 = vpack.c.bf16 %v376_v6, %v375_v4  ;;  %385 = vrot.lane.b32.xlu1 %v376_v6, %s1256_s4 }
 0x2a7   :  { %407 = vrot.lane.b32.xlu2 %v403_v7, %s1256_s4 }
 0x2b2   :  { %v370_v8 = vpop.permute.xlu2 %369 }
 0x2b3   :  { %v378_v9 = vmul.f32 %v370_v8, %v305_v48 }
 0x2b5   :  { %389 = vrot.lane.b32.xlu1 %v378_v9, %s1256_s4 }
 0x2c2   :  { %v368_v10 = vpop.permute.xlu1 %367 }
 0x2c3   :  { %v377_v11 = vmul.f32 %v368_v10, %v290_v40 }
 0x2c5   :  { %v404_v12 = vpack.c.bf16 %v378_v9, %v377_v11  ;;  %387 = vrot.lane.b32.xlu0 %v377_v11, %s1256_s4 }
 0x2c7   :  { %409 = vrot.lane.b32.xlu2 %v404_v12, %s1256_s4 }
 0x2f7   :  { %v384_v16 = vpop.permute.xlu0 %383 }
 0x2f8   :  { %395 = vst.msk [vmem:[#allocation3] sm:$0xff] %vm204_vm4, %v384_v16 }
 0x2ff   :  { %v608_v20 = vld [vmem:[#allocation3] sm:$0xff] }
 0x301   :  { %v408_v18 = vpop.permute.xlu2 %407 }
 0x302   :  { %1060 = vmatmul.msk.bf16.vlgmr.msrb.gmra.mxu1 %vm204_vm4, %v408_v18 }
 0x317   :  { %v386_v19 = vpop.permute.xlu1 %385 }
 0x318   :  { %396 = vst.msk [vmem:[#allocation3 + $0x8] sm:$0xff] %vm204_vm4, %v386_v19 }
 0x31f   :  { %v609_v21 = vld [vmem:[#allocation3 + $0x8] sm:$0xff] }
 0x320   :  { %v616_v22 = vpack.c.bf16 %v609_v21, %v608_v20 }
 0x321   :  { %v410_v24 = vpop.permute.xlu2 %409 }
 0x322   :  { %1061 = vmatmul.msk.bf16.gmra.mxu1 %vm204_vm4, %v410_v24  ;;  %1074 = vmatmul.msk.bf16.vlgmr.msrb.gmra.mxu2 %vm204_vm4, %v616_v22 }
 0x327   :  { %v390_v25 = vpop.permute.xlu1 %389 }
 0x328   :  { %398 = vst.msk [vmem:[#allocation3 + $0x18] sm:$0xff] %vm204_vm4, %v390_v25 }
 0x32f   :  { %v611_v29 = vld [vmem:[#allocation3 + $0x18] sm:$0xff] }
 0x337   :  { %v388_v26 = vpop.permute.xlu0 %387 }
 0x338   :  { %397 = vst.msk [vmem:[#allocation3 + $0x10] sm:$0xff] %vm204_vm4, %v388_v26 }
 0x33f   :  { %v610_v2 = vld [vmem:[#allocation3 + $0x10] sm:$0xff] }
 0x340   :  { %v617_v30 = vpack.c.bf16 %v611_v29, %v610_v2 }
 0x342   :  { %1075 = vmatmul.msk.bf16.gmra.mxu2 %vm204_vm4, %v617_v30 }
 0x37f   :  { %v426_v34 = vpop.f32.mrf.mxu1 }
 0x380   :  { %v436_v35 = vadd.f32 %v426_v34, %v171_v32 }
 0x382   :  { %1156 = vtanh.f32 %v436_v35  ;;  %v1062_v62 = vmul.f32 -1.442695, %v436_v35 }
 0x387   :  { %v428_v38 = vpop.f32.mrf.mxu1 }
 0x388   :  { %v1157_v39 = vpop.eup %1156  ;;  %v437_v40 = vadd.f32 %v428_v38, %v173_v37 }
 0x389   :  { %528 = vrot.lane.b32.xlu0 %v1157_v39, %s1255_s17 }
 0x38a   :  { %1158 = vtanh.f32 %v437_v40  ;;  %v1063_v6 = vmul.f32 -1.442695, %v437_v40 }
 0x390   :  { %v1159_v41 = vpop.eup %1158 }
 0x391   :  { %530 = vrot.lane.b32.xlu1 %v1159_v41, %s1255_s17 }
 0x39f   :  { %v431_v42 = vpop.f32.mrf.mxu1 }
 0x3a0   :  { %v438_v43 = vadd.f32 %v431_v42, %v1350_v23 }
 0x3a2   :  { %1160 = vtanh.f32 %v438_v43  ;;  %v1064_v7 = vmul.f32 -1.442695, %v438_v43 }
 0x3a5   :  { %v661_v33 = vpop.f32.mrf.mxu2 }
 0x3a6   :  { %v662_v45 = vadd.f32 %v1434_v28, %v661_v33 }
 0x3a7   :  { %v433_v46 = vpop.f32.mrf.mxu1 }
 0x3a8   :  { %v1161_v47 = vpop.eup %1160  ;;  %v728_v48 = vadd.f32 %v718_v44, %v662_v45  ;;  %v1438_v49 = vadd.f32 %v433_v46, %v1355_v27  ;;  %v723_v27 = vpop.f32.mrf.mxu3 }
 0x3a9   :  { %532 = vrot.lane.b32.xlu2 %v1161_v47, %s1255_s17 }
 0x3aa   :  { %1162 = vtanh.f32 %v728_v48  ;;  %v1086_v32 = vmul.f32 -1.442695, %v728_v48  ;;  %v1065_v35 = vmul.f32 -1.442695, %v1438_v49 }
 0x3ab   :  { %1164 = vtanh.f32 %v1438_v49 }
 0x3ad   :  { %v663_v23 = vpop.f32.mrf.mxu2 }
 0x3ae   :  { %v664_v50 = vadd.f32 %v1434_v28, %v663_v23 }
 0x3b0   :  { %v1163_v53 = vpop.eup %1162  ;;  %v729_v54 = vadd.f32 %v720_v51, %v664_v50  ;;  %v725_v1 = vpop.f32.mrf.mxu3 }
 0x3b1   :  { %v1165_v55 = vpop.eup %1164  ;;  %820 = vrot.lane.b32.xlu1 %v1163_v53, %s1255_s17 }
 0x3b2   :  { %1166 = vtanh.f32 %v729_v54  ;;  %534 = vrot.lane.b32.xlu0 %v1165_v55, %s1255_s17  ;;  %v1087_v16 = vmul.f32 -1.442695, %v729_v54 }
 0x3b8   :  { %v1167_v57 = vpop.eup %1166 }
 0x3b9   :  { %822 = vrot.lane.b32.xlu2 %v1167_v57, %s1255_s17 }
 0x3c5   :  { %v666_v58 = vpop.f32.mrf.mxu2 }
 0x3c6   :  { %v667_v59 = vadd.f32 %v1434_v28, %v666_v58 }
 0x3c8   :  { %v1447_v61 = vadd.f32 %v723_v27, %v667_v59 }
 0x3ca   :  { %1168 = vtanh.f32 %v1447_v61 }
 0x3cb   :  { %1170 = vpow2.f32 %v1062_v62 }
 0x3cd   :  { %v668_v63 = vpop.f32.mrf.mxu2 }
 0x3ce   :  { %v669_v3 = vadd.f32 %v1434_v28, %v668_v63 }
 0x3d0   :  { %v1169_v4 = vpop.eup %1168  ;;  %v1451_v5 = vadd.f32 %v725_v1, %v669_v3 }
 0x3d1   :  { %824 = vrot.lane.b32.xlu0 %v1169_v4, %s1255_s17  ;;  %v1171_v8 = vpop.eup %1170 }
 0x3d2   :  { %1172 = vtanh.f32 %v1451_v5  ;;  %v452_v10 = vadd.f32 1.0, %v1171_v8 }
 0x3d3   :  { %1174 = vpow2.f32 %v1063_v6 }
 0x3d4   :  { %1176 = vpow2.f32 %v1064_v7  ;;  %v467_v31 = vand.u32 2147483648, %v452_v10  ;;  %vm461_vm6 = vweird.f32 %v452_v10  ;;  %v465_v34 = vand.u32 2147483647, %v452_v10 }
 0x3d5   :  { %1178 = vrcp.f32 %v452_v10 }
 0x3d6   :  { %v468_v39 = vor.u32 1.1754944e-38, %v467_v31  ;;  %vm466_vm8 = vcmp.eq.f32.partialorder %v465_v34, 8.507059e+37 }
 0x3d8   :  { %v1173_v9 = vpop.eup %1172 }
 0x3d9   :  { %826 = vrot.lane.b32.xlu1 %v1173_v9, %s1255_s17  ;;  %v1175_v11 = vpop.eup %1174 }
 0x3da   :  { %v1177_v12 = vpop.eup %1176  ;;  %v453_v13 = vadd.f32 1.0, %v1175_v11 }
 0x3db   :  { %v454_v14 = vadd.f32 1.0, %v1177_v12  ;;  %v1179_v15 = vpop.eup %1178 }
 0x3dc   :  { %1180 = vrcp.f32 %v453_v13  ;;  %v457_v17 = vmul.f32 %v1179_v15, %v452_v10  ;;  %vm462_vm5 = vweird.f32 %v1179_v15  ;;  %vm476_vm11 = vweird.f32 %v453_v13 }
 0x3dd   :  { %1182 = vrcp.f32 %v454_v14  ;;  %vm463_vm7 = vmor %vm461_vm6, %vm462_vm5  ;;  %v497_v45 = vand.u32 2147483648, %v454_v14  ;;  %v482_v46 = vand.u32 2147483648, %v453_v13  ;;  %vm491_vm12 = vweird.f32 %v454_v14 }
 0x3de   :  { %1184 = vpow2.f32 %v1087_v16  ;;  %v458_v19 = vsub.f32 1.0, %v457_v17  ;;  %v495_v47 = vand.u32 2147483647, %v454_v14  ;;  %v480_v49 = vand.u32 2147483647, %v453_v13 }
 0x3df   :  { %v498_v55 = vor.u32 1.1754944e-38, %v497_v45  ;;  %v483_v57 = vor.u32 1.1754944e-38, %v482_v46 }
 0x3e0   :  { %v459_v22 = vmul.f32 %v1179_v15, %v458_v19  ;;  %vm496_vm15 = vcmp.eq.f32.partialorder %v495_v47, 8.507059e+37  ;;  %vm481_vm1 = vcmp.eq.f32.partialorder %v480_v49, 8.507059e+37 }
 0x3e2   :  { %v1181_v18 = vpop.eup %1180  ;;  %v460_v2 = vadd.f32 %v1179_v15, %v459_v22  ;;  %v1088_v22 = vmul.f32 -1.442695, %v1447_v61 }
 0x3e3   :  { %v1183_v20 = vpop.eup %1182  ;;  %v472_v25 = vmul.f32 %v1181_v18, %v453_v13  ;;  %vm477_vm9 = vweird.f32 %v1181_v18 }
 0x3e4   :  { %v1185_v21 = vpop.eup %1184  ;;  %v487_v24 = vmul.f32 %v1183_v20, %v454_v14  ;;  %v464_v36 = vsel %vm463_vm7, %v1179_v15, %v460_v2  ;;  %vm492_vm10 = vweird.f32 %v1183_v20  ;;  %vm1464_vm13 = vmor %vm476_vm11, %vm477_vm9 }
 0x3e5   :  { %v1456_v26 = vadd.f32 1.0, %v1185_v21  ;;  %v473_v30 = vsub.f32 1.0, %v472_v25  ;;  %v1460_v41 = vsel %vm466_vm8, %v468_v39, %v464_v36  ;;  %vm493_vm14 = vmor %vm491_vm12, %vm492_vm10 }
 0x3e6   :  { %v488_v29 = vsub.f32 1.0, %v487_v24 }
 0x3e7   :  { %1186 = vrcp.f32 %v1456_v26  ;;  %v474_v38 = vmul.f32 %v1181_v18, %v473_v30  ;;  %v774_v10 = vand.u32 2147483648, %v1456_v26  ;;  %vm768_vm3 = vweird.f32 %v1456_v26 }
 0x3e8   :  { %v489_v37 = vmul.f32 %v1183_v20, %v488_v29  ;;  %1188 = vpow2.f32 %v1086_v32  ;;  %v772_v12 = vand.u32 2147483647, %v1456_v26  ;;  %v1089_v30 = vmul.f32 -1.442695, %v1451_v5 }
 0x3e9   :  { %1190 = vpow2.f32 %v1065_v35  ;;  %v475_v44 = vadd.f32 %v1181_v18, %v474_v38  ;;  %v775_v15 = vor.u32 1.1754944e-38, %v774_v10 }
 0x3ea   :  { %v490_v43 = vadd.f32 %v1183_v20, %v489_v37  ;;  %vm773_vm6 = vcmp.eq.f32.partialorder %v772_v12, 8.507059e+37 }
 0x3eb   :  { %v479_v51 = vsel %vm1464_vm13, %v1181_v18, %v475_v44 }
 0x3ec   :  { %v494_v50 = vsel %vm493_vm14, %v1183_v20, %v490_v43  ;;  %v1473_v63 = vsel %vm481_vm1, %v483_v57, %v479_v51 }
 0x3ed   :  { %v1187_v33 = vpop.eup %1186  ;;  %v1471_v59 = vsel %vm496_vm15, %v498_v55, %v494_v50 }
 0x3ee   :  { %v1189_v23 = vpop.eup %1188  ;;  %v764_v53 = vmul.f32 %v1187_v33, %v1456_v26  ;;  %vm769_vm2 = vweird.f32 %v1187_v33 }
 0x3ef   :  { %v1191_v54 = vpop.eup %1190  ;;  %v744_v27 = vadd.f32 1.0, %v1189_v23  ;;  %vm770_vm5 = vmor %vm768_vm3, %vm769_vm2 }
 0x3f0   :  { %v455_v1 = vadd.f32 1.0, %v1191_v54  ;;  %v765_v6 = vsub.f32 1.0, %v764_v53 }
 0x3f1   :  { %1192 = vrcp.f32 %v744_v27  ;;  %v759_v2 = vand.u32 2147483648, %v744_v27  ;;  %vm753_vm9 = vweird.f32 %v744_v27  ;;  %v757_v31 = vand.u32 2147483647, %v744_v27 }
 0x3f2   :  { %1194 = vrcp.f32 %v455_v1  ;;  %v766_v7 = vmul.f32 %v1187_v33, %v765_v6  ;;  %v512_v32 = vand.u32 2147483648, %v455_v1  ;;  %vm506_vm11 = vweird.f32 %v455_v1 }
 0x3f3   :  { %1196 = vpow2.f32 %v1088_v22  ;;  %v510_v34 = vand.u32 2147483647, %v455_v1  ;;  %v760_v36 = vor.u32 1.1754944e-38, %v759_v2  ;;  %vm758_vm13 = vcmp.eq.f32.partialorder %v757_v31, 8.507059e+37 }
 0x3f4   :  { %v767_v8 = vadd.f32 %v1187_v33, %v766_v7  ;;  %1198 = vpow2.f32 %v1089_v30  ;;  %v513_v38 = vor.u32 1.1754944e-38, %v512_v32 }
 0x3f5   :  { %vm511_vm14 = vcmp.eq.f32.partialorder %v510_v34, 8.507059e+37 }
 0x3f6   :  { %v771_v13 = vsel %vm770_vm5, %v1187_v33, %v767_v8 }
 0x3f7   :  { %v1193_v9 = vpop.eup %1192  ;;  %v1482_v18 = vsel %vm773_vm6, %v775_v15, %v771_v13 }
 0x3f8   :  { %v1195_v11 = vpop.eup %1194  ;;  %v749_v14 = vmul.f32 %v1193_v9, %v744_v27  ;;  %vm754_vm7 = vweird.f32 %v1193_v9 }
 0x3f9   :  { %v502_v16 = vmul.f32 %v1195_v11, %v455_v1  ;;  %vm507_vm8 = vweird.f32 %v1195_v11  ;;  %vm755_vm10 = vmor %vm753_vm9, %vm754_vm7  ;;  %v1197_v35 = vpop.eup %1196 }
 0x3fa   :  { %v750_v20 = vsub.f32 1.0, %v749_v14  ;;  %vm508_vm12 = vmor %vm506_vm11, %vm507_vm8  ;;  %v746_v39 = vadd.f32 1.0, %v1197_v35  ;;  %v1199_v45 = vpop.eup %1198  ;;  %v520_v14 = vmul.f32 %v1460_v41, %v1381_v52 }
 0x3fb   :  { %v529_v40 = vpop.permute.xlu0 %528  ;;  %v503_v21 = vsub.f32 1.0, %v502_v16  ;;  %v747_v46 = vadd.f32 1.0, %v1199_v45 }
 0x3fc   :  { %v540_v42 = vmul.f32 %v529_v40, %v1460_v41  ;;  %v751_v24 = vmul.f32 %v1193_v9, %v750_v20  ;;  %1200 = vrcp.f32 %v746_v39  ;;  %v789_v55 = vand.u32 2147483648, %v746_v39 }
 0x3fd   :  { %v504_v25 = vmul.f32 %v1195_v11, %v503_v21  ;;  %1202 = vrcp.f32 %v747_v46  ;;  %vm783_vm1 = vweird.f32 %v746_v39  ;;  %v787_v57 = vand.u32 2147483647, %v746_v39 }
 0x3fe   :  { %548 = vrot.lane.b32.xlu2 %v540_v42, %s1256_s4  ;;  %v752_v26 = vadd.f32 %v1193_v9, %v751_v24  ;;  %v804_v7 = vand.u32 2147483648, %v747_v46  ;;  %vm798_vm6 = vweird.f32 %v747_v46  ;;  %v802_v8 = vand.u32 2147483647, %v747_v46 }
 0x3ff   :  { %v505_v29 = vadd.f32 %v1195_v11, %v504_v25  ;;  %vm788_vm3 = vcmp.eq.f32.partialorder %v787_v57, 8.507059e+37  ;;  %v521_v20 = vmul.f32 %v1473_v63, %v1384_v56  ;;  %v813_v56 = vmul.f32 0.0, %v1482_v18 }
 0x400   :  { %v756_v61 = vsel %vm755_vm10, %v1193_v9, %v752_v26  ;;  %v805_v10 = vor.u32 1.1754944e-38, %v804_v7  ;;  %vm803_vm8 = vcmp.eq.f32.partialorder %v802_v8, 8.507059e+37 }
 0x401   :  { %v509_v37 = vsel %vm508_vm12, %v1195_v11, %v505_v29  ;;  %v1488_v40 = vsel %vm758_vm13, %v760_v36, %v756_v61  ;;  %vm996_vm13 = vcmask 74752  }
 0x402   :  { %v1491_v43 = vsel %vm511_vm14, %v513_v38, %v509_v37  ;;  %v1201_v47 = vpop.eup %1200 }
 0x403   :  { %v533_v58 = vpop.permute.xlu2 %532  ;;  %v531_v62 = vpop.permute.xlu1 %530  ;;  %v779_v48 = vmul.f32 %v1201_v47, %v746_v39  ;;  %vm784_vm15 = vweird.f32 %v1201_v47  ;;  %v523_v52 = vmul.f32 %v1491_v43, %v1392_v0  ;;  %v812_v0 = vmul.f32 0.0, %v1488_v40 }
 0x404   :  { %v542_v3 = vmul.f32 %v533_v58, %v1471_v59  ;;  %v541_v4 = vmul.f32 %v531_v62, %v1473_v63  ;;  %v1203_v23 = vpop.eup %1202  ;;  %vm785_vm2 = vmor %vm783_vm1, %vm784_vm15  ;;  %v790_v62 = vor.u32 1.1754944e-38, %v789_v55 }
 0x405   :  { %v780_v49 = vsub.f32 1.0, %v779_v48  ;;  %v794_v51 = vmul.f32 %v1203_v23, %v747_v46  ;;  %vm799_vm5 = vweird.f32 %v1203_v23 }
 0x406   :  { %552 = vrot.lane.b32.xlu1 %v542_v3, %s1256_s4  ;;  %550 = vrot.lane.b32.xlu0 %v541_v4, %s1256_s4  ;;  %vm800_vm7 = vmor %vm798_vm6, %vm799_vm5 }
 0x407   :  { %v781_v50 = vmul.f32 %v1201_v47, %v780_v49  ;;  %v795_v54 = vsub.f32 1.0, %v794_v51 }
 0x409   :  { %v782_v53 = vadd.f32 %v1201_v47, %v781_v50  ;;  %v796_v58 = vmul.f32 %v1203_v23, %v795_v54 }
 0x40b   :  { %v786_v27 = vsel %vm785_vm2, %v1201_v47, %v782_v53  ;;  %v797_v6 = vadd.f32 %v1203_v23, %v796_v58 }
 0x40c   :  { %v1496_v1 = vsel %vm788_vm3, %v790_v62, %v786_v27 }
 0x40d   :  { %v801_v9 = vsel %vm800_vm7, %v1203_v23, %v797_v6  ;;  %v814_v36 = vmul.f32 0.0, %v1496_v1 }
 0x40e   :  { %v1500_v11 = vsel %vm803_vm8, %v805_v10, %v801_v9 }
 0x413   :  { %v823_v17 = vpop.permute.xlu2 %822 }
 0x414   :  { %v833_v19 = vmul.f32 %v823_v17, %v1482_v18 }
 0x416   :  { %842 = vrot.lane.b32.xlu1 %v833_v19, %s1256_s4  ;;  %v522_v19 = vmul.f32 %v1471_v59, %v1389_v60 }
 0x423   :  { %v821_v42 = vpop.permute.xlu1 %820 }
 0x424   :  { %v832_v5 = vmul.f32 %v821_v42, %v1488_v40  ;;  %v535_v44 = vpop.permute.xlu0 %534 }
 0x425   :  { %v543_v33 = vmul.f32 %v535_v44, %v1491_v43 }
 0x426   :  { %840 = vrot.lane.b32.xlu0 %v832_v5, %s1256_s4  ;;  %v815_v5 = vmul.f32 0.0, %v1500_v11 }
 0x427   :  { %554 = vrot.lane.b32.xlu2 %v543_v33, %s1256_s4 }
 0x443   :  { %v825_v3 = vpop.permute.xlu0 %824 }
 0x444   :  { %v834_v4 = vmul.f32 %v825_v3, %v1496_v1 }
 0x446   :  { %844 = vrot.lane.b32.xlu2 %v834_v4, %s1256_s4 }
 0x44b   :  { %v827_v12 = vpop.permute.xlu1 %826 }
 0x44c   :  { %v835_v13 = vmul.f32 %v827_v12, %v1500_v11 }
 0x44e   :  { %846 = vrot.lane.b32.xlu0 %v835_v13, %s1256_s4 }
 0x458   :  { %v549_v15 = vpop.permute.xlu2 %548 }
 0x459   :  { %v560_v16 = vadd.f32 %v549_v15, %v520_v14 }
 0x45b   :  { %1204 = vtanh.f32 %v560_v16 }
 0x461   :  { %v1205_v17 = vpop.eup %1204 }
 0x462   :  { %572 = vrot.lane.b32.xlu1 %v1205_v17, %s1255_s17 }
 0x478   :  { %v553_v21 = vpop.permute.xlu1 %552  ;;  %v551_v22 = vpop.permute.xlu0 %550 }
 0x479   :  { %v562_v24 = vadd.f32 %v553_v21, %v522_v19  ;;  %v561_v25 = vadd.f32 %v551_v22, %v521_v20 }
 0x47b   :  { %1206 = vtanh.f32 %v562_v24 }
 0x47c   :  { %1208 = vtanh.f32 %v561_v25 }
 0x481   :  { %v1207_v26 = vpop.eup %1206  ;;  %v555_v2 = vpop.permute.xlu2 %554 }
 0x482   :  { %v1209_v29 = vpop.eup %1208  ;;  %v563_v30 = vadd.f32 %v555_v2, %v523_v52  ;;  %576 = vrot.lane.b32.xlu0 %v1207_v26, %s1255_s17 }
 0x483   :  { %574 = vrot.lane.b32.xlu2 %v1209_v29, %s1255_s17 }
 0x484   :  { %1210 = vtanh.f32 %v563_v30 }
 0x488   :  { %v843_v60 = vpop.permute.xlu1 %842 }
 0x489   :  { %v853_v31 = vadd.f32 %v843_v60, %v813_v56 }
 0x48a   :  { %v1211_v32 = vpop.eup %1210 }
 0x48b   :  { %1212 = vtanh.f32 %v853_v31  ;;  %578 = vrot.lane.b32.xlu1 %v1211_v32, %s1255_s17 }
 0x491   :  { %v1213_v34 = vpop.eup %1212 }
 0x492   :  { %866 = vrot.lane.b32.xlu0 %v1213_v34, %s1255_s17 }
 0x498   :  { %v841_v35 = vpop.permute.xlu0 %840 }
 0x499   :  { %v852_v61 = vadd.f32 %v841_v35, %v812_v0 }
 0x49b   :  { %1214 = vtanh.f32 %v852_v61 }
 0x4a0   :  { %v845_v37 = vpop.permute.xlu2 %844 }
 0x4a1   :  { %v1215_v38 = vpop.eup %1214  ;;  %v854_v39 = vadd.f32 %v845_v37, %v814_v36 }
 0x4a2   :  { %864 = vrot.lane.b32.xlu2 %v1215_v38, %s1255_s17 }
 0x4a3   :  { %1216 = vtanh.f32 %v854_v39 }
 0x4a9   :  { %v1217_v42 = vpop.eup %1216 }
 0x4aa   :  { %868 = vrot.lane.b32.xlu1 %v1217_v42, %s1255_s17 }
 0x4c0   :  { %v847_v44 = vpop.permute.xlu0 %846 }
 0x4c1   :  { %v1523_v33 = vadd.f32 %v847_v44, %v815_v5  ;;  %v1116_v5 = vld [vmem:[%s1581_s8 + $0x8] sm:$0xff]  ;;  %v1115_v44 = vld [vmem:[%s1581_s8] sm:$0xff]  ;;  %s1003_s8 = sshll.u32 %s1257_s0, 4  ;;  %s1004_s8 = int_to_ptr.vmem [resolvable:$true] %s1003_s8 }
 0x4c2   :  { %989 = vmatpush.bf16.msra.mxu1 %v1116_v5 }
 0x4c3   :  { %1218 = vtanh.f32 %v1523_v33 }
 0x4c6   :  { %990 = vmatpush.bf16.msra.mxu1 %v1115_v44 }
 0x4c9   :  { %v1219_v45 = vpop.eup %1218 }
 0x4ca   :  { %870 = vrot.lane.b32.xlu2 %v1219_v45, %s1255_s17 }
 0x4d4   :  { %v573_v46 = vpop.permute.xlu1 %572 }
 0x4d5   :  { %v584_v47 = vmul.f32 %v573_v46, %v1460_v41 }
 0x4d7   :  { %592 = vrot.lane.b32.xlu0 %v584_v47, %s1256_s4 }
 0x4dd   :  { %v575_v48 = vpop.permute.xlu2 %574 }
 0x4de   :  { %v585_v49 = vmul.f32 %v575_v48, %v1473_v63 }
 0x4e0   :  { %594 = vrot.lane.b32.xlu1 %v585_v49, %s1256_s4 }
 0x4f4   :  { %v577_v23 = vpop.permute.xlu0 %576 }
 0x4f5   :  { %v586_v50 = vmul.f32 %v577_v23, %v1471_v59 }
 0x4f7   :  { %596 = vrot.lane.b32.xlu2 %v586_v50, %s1256_s4  ;;  %v1123_v50 = vld [vmem:[%s1582_s9] ss:$0 sm:$0xff] }
 0x4fc   :  { %v865_v54 = vpop.permute.xlu2 %864 }
 0x4fd   :  { %v579_v51 = vpop.permute.xlu1 %578  ;;  %v876_v41 = vmul.f32 %v865_v54, %v1488_v40 }
 0x4fe   :  { %v587_v53 = vmul.f32 %v579_v51, %v1491_v43 }
 0x500   :  { %598 = vrot.lane.b32.xlu0 %v587_v53, %s1256_s4 }
 0x504   :  { %v867_v55 = vpop.permute.xlu0 %866 }
 0x505   :  { %v877_v57 = vmul.f32 %v867_v55, %v1482_v18 }
 0x507   :  { %v881_v27 = vpack.c.bf16 %v877_v57, %v876_v41 }
 0x509   :  { %885 = vrot.lane.b32.xlu1 %v881_v27, %s1256_s4 }
 0x51c   :  { %v869_v63 = vpop.permute.xlu1 %868 }
 0x51d   :  { %v878_v59 = vmul.f32 %v869_v63, %v1496_v1 }
 0x524   :  { %v871_v58 = vpop.permute.xlu2 %870 }
 0x525   :  { %v1540_v62 = vmul.f32 %v871_v58, %v1500_v11 }
 0x527   :  { %v882_v43 = vpack.c.bf16 %v1540_v62, %v878_v59 }
 0x529   :  { %887 = vrot.lane.b32.xlu2 %v882_v43, %s1256_s4 }
 0x549   :  { %v593_v3 = vpop.permute.xlu0 %592 }
 0x54a   :  { %604 = vst.msk [vmem:[#allocation3 + $0x20] sm:$0xff] %vm204_vm4, %v593_v3 }
 0x551   :  { %v597_v40 = vpop.permute.xlu2 %596  ;;  %v612_v4 = vld [vmem:[#allocation3 + $0x20] sm:$0xff] }
 0x552   :  { %606 = vst.msk [vmem:[#allocation3 + $0x30] sm:$0xff] %vm204_vm4, %v597_v40  ;;  %v595_v18 = vpop.permute.xlu1 %594 }
 0x553   :  { %605 = vst.msk [vmem:[#allocation3 + $0x28] sm:$0xff] %vm204_vm4, %v595_v18 }
 0x559   :  { %v614_v8 = vld [vmem:[#allocation3 + $0x30] sm:$0xff] }
 0x55a   :  { %v613_v6 = vld [vmem:[#allocation3 + $0x28] sm:$0xff] }
 0x55b   :  { %v618_v7 = vpack.c.bf16 %v613_v6, %v612_v4 }
 0x55d   :  { %1076 = vmatmul.msk.bf16.gmra.mxu2 %vm204_vm4, %v618_v7 }
 0x572   :  { %v599_v1 = vpop.permute.xlu0 %598 }
 0x573   :  { %607 = vst.msk [vmem:[#allocation3 + $0x38] sm:$0xff] %vm204_vm4, %v599_v1 }
 0x57a   :  { %v615_v9 = vld [vmem:[#allocation3 + $0x38] sm:$0xff] }
 0x57b   :  { %v886_v10 = vpop.permute.xlu1 %885  ;;  %v619_v11 = vpack.c.bf16 %v615_v9, %v614_v8 }
 0x57c   :  { %1090 = vmatmul.msk.bf16.vlgmr.msrb.gmra.mxu0 %vm204_vm4, %v886_v10 }
 0x57d   :  { %1077 = vmatmul.msk.bf16.gmra.mxu2 %vm204_vm4, %v619_v11 }
 0x583   :  { %v888_v12 = vpop.permute.xlu2 %887 }
 0x58c   :  { %1091 = vmatmul.msk.bf16.gmra.mxu0 %vm204_vm4, %v888_v12 }
 0x5e0   :  { %v671_v13 = vpop.f32.mrf.mxu2 }
 0x5e8   :  { %v673_v14 = vpop.f32.mrf.mxu2 }
 0x5f9   :  { %v904_v15 = vpop.f32.mrf.mxu0 }
 0x600   :  { %v676_v16 = vpop.f32.mrf.mxu2 }
 0x601   :  { %v905_v17 = vpop.f32.mrf.mxu0 }
 0x608   :  { %v678_v20 = vpop.f32.mrf.mxu2 }
 0x609   :  { %v907_v19 = vpop.f32.mrf.mxu0  ;;  %v679_v21 = vadd.f32 %v1434_v28, %v678_v20 }
 0x611   :  { %v908_v22 = vpop.f32.mrf.mxu0 }
 0x612   :  { %v911_v24 = vadd.f32 %v908_v22, %v679_v21 }
 0x614   :  { %1220 = vtanh.f32 %v911_v24  ;;  %v1092_v52 = vmul.f32 -1.442695, %v911_v24 }
 0x616   :  { %1222 = vpow2.f32 %v1092_v52 }
 0x61a   :  { %v1221_v25 = vpop.eup %1220 }
 0x61b   :  { %934 = vrot.lane.b32.xlu0 %v1221_v25, %s1255_s17 }
 0x61c   :  { %v1223_v26 = vpop.eup %1222 }
 0x61d   :  { %v915_v2 = vadd.f32 1.0, %v1223_v26 }
 0x61f   :  { %1224 = vrcp.f32 %v915_v2  ;;  %v927_v32 = vand.u32 2147483648, %v915_v2  ;;  %vm921_vm10 = vweird.f32 %v915_v2  ;;  %v925_v28 = vand.u32 2147483647, %v915_v2 }
 0x621   :  { %v928_v0 = vor.u32 1.1754944e-38, %v927_v32  ;;  %vm926_vm12 = vcmp.eq.f32.partialorder %v925_v28, 8.507059e+37 }
 0x625   :  { %v1225_v29 = vpop.eup %1224 }
 0x626   :  { %v917_v30 = vmul.f32 %v1225_v29, %v915_v2  ;;  %vm922_vm9 = vweird.f32 %v1225_v29 }
 0x627   :  { %vm923_vm11 = vmor %vm921_vm10, %vm922_vm9 }
 0x628   :  { %v918_v56 = vsub.f32 1.0, %v917_v30 }
 0x62a   :  { %v919_v60 = vmul.f32 %v1225_v29, %v918_v56 }
 0x62c   :  { %v920_v31 = vadd.f32 %v1225_v29, %v919_v60 }
 0x62e   :  { %v924_v34 = vsel %vm923_vm11, %v1225_v29, %v920_v31 }
 0x62f   :  { %v929_v61 = vsel %vm926_vm12, %v928_v0, %v924_v34 }
 0x630   :  { %v932_v37 = vmul.f32 %v929_v61, %v1523_v33  ;;  %v950_v33 = vrot.slane %v1540_v62, 7 }
 0x68d   :  { %v935_v35 = vpop.permute.xlu0 %934 }
 0x68e   :  { %v937_v36 = vmul.f32 %v935_v35, %v929_v61 }
 0x690   :  { %939 = vrot.lane.b32.xlu1 %v937_v36, %s1256_s4 }
 0x702   :  { %v940_v38 = vpop.permute.xlu1 %939 }
 0x703   :  { %v942_v39 = vadd.f32 %v940_v38, %v932_v37 }
 0x705   :  { %1226 = vtanh.f32 %v942_v39 }
 0x70b   :  { %v1227_v42 = vpop.eup %1226 }
 0x70c   :  { %945 = vrot.lane.b32.xlu2 %v1227_v42, %s1255_s17 }
 0x766   :  { %v946_v45 = vpop.permute.xlu2 %945 }
 0x767   :  { %v948_v46 = vmul.f32 %v946_v45, %v929_v61 }
 0x769   :  { %v953_v47 = vrot.slane %v948_v46, 6 }
 0x76b   :  { %v955_v48 = vsel %vm86_vm0, %v950_v33, %v953_v47 }
 0x76c   :  { %v956_v49 = vpack.c.bf16 %v955_v48, %v955_v48 }
 0x76e   :  { %966 = vrot.lane.b32.xlu0 %v956_v49, %s1256_s4 }
 0x7e0   :  { %v967_v23 = vpop.permute.xlu0 %966 }
 0x7e1   :  { %1101 = vmatmul.msk.bf16.vlgmr.msra.gmra.mxu1 %vm204_vm4, %v967_v23 }
 0x85e   :  { %v992_v51 = vpop.f32.mrf.mxu1 }
 0x85f   :  { %v993_v53 = vadd.f32 %v1123_v50, %v992_v51 }
 0x861   :  { %997 = vst.msk [vmem:[#allocation4] sm:$0x3] %vm996_vm13, %v993_v53 }
 0x862   :  { %1008 = dma.vmem_to_hbm [thread:$0]  %s1004_s8, 32, %s1006_s11, [#allocation5]  }
 0x866   :  { %v994_v54 = vpop.f32.mrf.mxu1 }
 0x867   :  { %1252 = dma.done.wait [#allocation5], 32  }
 0x868   :  { %1253 = vsyncadd [#allocation5], 4294967264 }
 0x869   :  { %1013 = vsyncpa [#allocation5], 1 }

</bundles_post_ra>
